<compile_context>
chip_gen: v7x
topology: tpu7x:2x2x1
jax: 0.10.0
libtpu: 0.0.40
codegen_flags: <defaults>
</compile_context>

<pallas_src>
import math
import numpy as np
import jax
import jax.numpy as jnp
from jax.experimental import pallas as pl
from jax.experimental.pallas import tpu as pltpu


# ---------------------------------------------------------------------------
# Parameter setup (DWT_2D_tiny.get_matrix for wavename='haar').
# pywt.Wavelet('haar'): rec_lo = [1/sqrt(2), 1/sqrt(2)]  (rec_hi unused for LL).
# ---------------------------------------------------------------------------
def build_haar_low_matrices(H, W):
    band_low = [1.0 / math.sqrt(2.0), 1.0 / math.sqrt(2.0)]
    band_length = len(band_low)
    assert band_length % 2 == 0
    half = band_length // 2

    L1 = max(H, W)
    L = L1 // 2
    matrix_h = np.zeros((L, L1 + band_length - 2), dtype=np.float64)
    end = None if half == 1 else (-half + 1)

    index = 0
    for i in range(L):
        for j in range(band_length):
            matrix_h[i, index + j] = band_low[j]
        index += 2

    matrix_h_0 = matrix_h[0:H // 2, 0:H + band_length - 2]
    matrix_h_1 = matrix_h[0:W // 2, 0:W + band_length - 2]
    matrix_h_0 = matrix_h_0[:, half - 1:end]                  # (H//2, H)
    matrix_h_1 = np.transpose(matrix_h_1[:, half - 1:end])    # (W, W//2)
    return matrix_h_0.astype(np.float32), matrix_h_1.astype(np.float32)


def build_fold_matrix(H, W, k):
    """Block-diagonal (2*k*W, k*W//2) pooling matrix equivalent to
    ML0 @ plane @ ML1 acting on k folded haar row-pairs."""
    ml0, ml1 = build_haar_low_matrices(H, W)
    W2 = W // 2
    # haar: ML0[i, 2i] == ML0[i, 2i+1] == 1/sqrt(2) and the filter only touches
    # rows 2i, 2i+1  ->  per-row-pair combined matrix:
    c = ml0[0, 0]                                             # 1/sqrt(2)
    m_pair = c * np.concatenate([ml1, ml1], axis=0)           # (2W, W2)
    m_fold = np.zeros((2 * k * W, k * W2), dtype=np.float32)
    for t in range(k):
        m_fold[t * 2 * W:(t + 1) * 2 * W, t * W2:(t + 1) * W2] = m_pair
    return m_fold


# ---------------------------------------------------------------------------
# Tiling heuristics.
# ---------------------------------------------------------------------------
def _pick_fold(R, W, W2, lane_target=128, max_mat_bytes=2 << 20, max_k=512):
    """Smallest divisor k of R with k*W2 >= lane_target (lane-dense output) and
    a small fold matrix; falls back to the largest admissible divisor."""
    best = 1
    for k in range(1, min(R, max_k) + 1):
        if R % k:
            continue
        if (2 * k * W) * (k * W2) * 4 > max_mat_bytes:
            break
        best = k
        if k * W2 >= lane_target:
            break
    return best


def _pick_row_tile(Rk, row_bytes, target_bytes=4 << 20):
    """Rows per grid step: ~target_bytes of input per block (double-buffered
    input + output stays well under 32 MiB scoped VMEM, v7x-safe); multiple of 8."""
    if Rk <= 8:
        return Rk
    tm = min(Rk, max(8, target_bytes // max(1, row_bytes)))
    tm = max(8, (tm // 8) * 8)
    return Rk if tm >= Rk else tm


# ---------------------------------------------------------------------------
# Pallas kernel: one big lane-dense matmul per block on the MXU.
# ---------------------------------------------------------------------------
def dwt_ll_kernel(m_ref, x_ref, o_ref):
    acc = jnp.dot(x_ref[...], m_ref[...], preferred_element_type=jnp.float32)
    o_ref[...] = acc if acc.dtype == o_ref.dtype else acc.astype(o_ref.dtype)


def dwt_2d_tiny(x):
    """x: (N, C, H, W) float32 -> LL: (N, C, H//2, W//2)."""
    # TODO(synk): this single-matmul collapse is haar-specific (filter length 2);
    # longer wavelets (bior*, db*) need the general ML0 @ x @ ML1 path.
    N, C, H, W = x.shape
    assert H % 2 == 0 and W % 2 == 0, "DWT_2D_tiny assumes even H and W"
    H2, W2 = H // 2, W // 2

    R = N * C * H2                       # total LL rows across all planes
    k = _pick_fold(R, W, W2)             # LL rows folded onto the lane axis
    Rk = R // k
    KF = 2 * k * W                       # contraction length per folded row
    LF = k * W2                          # lane-dense output width

    m_fold = jnp.asarray(build_fold_matrix(H, W, k))          # (KF, LF)
    x2 = x.reshape(Rk, KF)               # free contiguous reshape

    TM = _pick_row_tile(Rk, KF * x.dtype.itemsize)
    grid = (pl.cdiv(Rk, TM),)

    out = pl.pallas_call(
        dwt_ll_kernel,
        out_shape=jax.ShapeDtypeStruct((Rk, LF), x.dtype),
        grid=grid,
        in_specs=[
            pl.BlockSpec((KF, LF), lambda i: (0, 0)),   # pooling matrix: resident
            pl.BlockSpec((TM, KF), lambda i: (i, 0)),   # big batch of folded rows
        ],
        out_specs=pl.BlockSpec((TM, LF), lambda i: (i, 0)),
        compiler_params=pltpu.CompilerParams(
            dimension_semantics=("parallel",),
            vmem_limit_bytes=32 * 1024 * 1024),
    )(m_fold, x2)

    return out.reshape(N, C, H2, W2)


if __name__ == "__main__":
    key = jax.random.PRNGKey(0)
    N, C, H, W = 2, 4, 16, 16
    x = jax.random.normal(key, (N, C, H, W), dtype=jnp.float32)

    ll = jax.block_until_ready(dwt_2d_tiny(x))

    # Pure-JAX reference of the original forward: ML0 @ x @ ML1.
    ml0, ml1 = build_haar_low_matrices(H, W)
    ref = jnp.einsum('ph,nchw,wq->ncpq', jnp.asarray(ml0), x, jnp.asarray(ml1))

    assert ll.shape == (N, C, H // 2, W // 2), ll.shape
    np.testing.assert_allclose(np.asarray(ll), np.asarray(ref),
                               rtol=1e-5, atol=1e-5)
    print("KERNEL_OK")
</pallas_src>

<mosaic_0001>
module attributes {stable_mosaic.version = 11 : i64} {
  func.func @dwt_ll_kernel(%arg0: i32, %arg1: memref<512x128xf32, #tpu.memory_space<vmem>>, %arg2: memref<4x512xf32, #tpu.memory_space<vmem>>, %arg3: memref<4x128xf32, #tpu.memory_space<vmem>>) attributes {dimension_semantics = [#tpu.dimension_semantics<parallel>], iteration_bounds = array<i64: 1>, scalar_prefetch = 0 : i64, scratch_operands = 0 : i64, tpu.core_type = #tpu.core_type<tc>, window_params = [{pipeline_mode = #tpu.pipeline_mode<synchronous>, transform_indices = @transform_0, window_bounds = array<i64: 512, 128>}, {transform_indices = @transform_1, window_bounds = array<i64: 4, 512>}, {transform_indices = @transform_2, window_bounds = array<i64: 4, 128>}]} {
    %c0 = arith.constant 0 : index
    %c0_0 = arith.constant 0 : index
    %0 = vector.load %arg2[%c0, %c0_0] : memref<4x512xf32, #tpu.memory_space<vmem>>, vector<4x512xf32>
    %c0_1 = arith.constant 0 : index
    %c0_2 = arith.constant 0 : index
    %1 = vector.load %arg1[%c0_1, %c0_2] : memref<512x128xf32, #tpu.memory_space<vmem>>, vector<512x128xf32>
    %cst = arith.constant dense<0.000000e+00> : vector<4x128xf32>
    %2 = tpu.matmul %0, %1, %cst {dimension_numbers = #tpu.dot_dimension_numbers<[1], [0], [0], [1], [0, 0, 1, 1], [], []>} : vector<4x512xf32>, vector<512x128xf32>, vector<4x128xf32> -> vector<4x128xf32>
    %c0_3 = arith.constant 0 : index
    %c0_4 = arith.constant 0 : index
    %3 = vector.load %arg3[%c0_3, %c0_4] : memref<4x128xf32, #tpu.memory_space<vmem>>, vector<4x128xf32>
    tpu.vector_store %arg3[%c0_3, %c0_4], %2 {strides = array<i32>} : memref<4x128xf32, #tpu.memory_space<vmem>>, vector<4x128xf32>,
    return
  }
  func.func @transform_0(%arg0: i32) -> (i32, i32) {
    %c0_i32 = arith.constant 0 : i32
    %c0_i32_0 = arith.constant 0 : i32
    %c0_i32_1 = arith.constant 0 : i32
    return %c0_i32, %c0_i32_0 : i32, i32
  }
  func.func @transform_1(%arg0: i32) -> (i32, i32) {
    %c0_i32 = arith.constant 0 : i32
    %c0_i32_0 = arith.constant 0 : i32
    return %arg0, %c0_i32 : i32, i32
  }
  func.func @transform_2(%arg0: i32) -> (i32, i32) {
    %c0_i32 = arith.constant 0 : i32
    %c0_i32_0 = arith.constant 0 : i32
    return %arg0, %c0_i32 : i32, i32
  }
}

</mosaic_0001>

<bundles_post_ra>
// kernel: tpu_custom_call.1
= control target key start
LH: loop header
LB: loop body
LE: loop exit
PB: predicated region body
PF: predicated region fallthrough
CT: control target
= control target key end

     0   :  { %7 = vsyncpa [#allocation3], 0  ;;  %s536_s0 = inlined_call_operand.hbm [shape: f32[512,128], index: 0, kind: input, shape index: {}]   ;;  %s537_s1 = inlined_call_operand.hbm [shape: f32[4,512], index: 1, kind: input, shape index: {}]   ;;  %s538_s2 = inlined_call_operand.hbm [shape: f32[4,128], index: 2, kind: output, shape index: {}]  }
   0x1   :  { %8 = vsyncpa [#allocation6], 0 }
   0x2   :  { %9 = vsyncpa [#allocation4], 0  ;;  %s480_s9 = smov [#allocation2]   ;;  %s408_s13 = scalar_lea.hbm %s536_s0, 8192 }
   0x3   :  { %s15_s10 = sshll.u32 %s480_s9, 4  ;;  %p409_p0 = scmp.ne.s32.totalorder %s536_s0, %s408_s13  ;;  %s16_s10 = int_to_ptr.vmem [resolvable:$true] %s15_s10 }
   0x4   :  { %p412_p1 = scmp.lt.u32.totalorder %s408_s13, %s536_s0 }
   0x6   :  { %p414_p2 = pnand %p412_p1, %p409_p0 }
   0x8   :  { %417 = shalt.err (!%p414_p2)
}
   0x9   :  { %s418_s18 = scalar_lea.vmem %s16_s10, 8192  ;;  %p423_p4 = scmp.lt.s32.totalorder %s16_s10, %s16_s10 }
   0xa   :  { %p419_p3 = scmp.ne.s32.totalorder %s16_s10, %s418_s18  ;;  %p424_p5 = scmp.lt.s32.totalorder %s418_s18, %s418_s18 }
   0xc   :  { %p425_p6 = por %p424_p5, %p423_p4 }
   0xe   :  { %p426_p7 = pnand %p425_p6, %p419_p3 }
  0x10   :  { %429 = shalt.err (!%p426_p7)
}
  0x11   :  { %s481_s19 = smov 128   ;;  %s482_s20 = smov 8  }
  0x12   :  { %21 = dma.hbm_to_vmem [thread:$0]  %s536_s0, 8192, %s16_s10, [#allocation3], %s481_s19, %s481_s19, %s482_s20  }
  0x13   :  { %s483_s23 = smov [#allocation5]   ;;  %s430_s27 = scalar_lea.hbm %s537_s1, 256 }
  0x14   :  { %s28_s24 = sshll.u32 %s483_s23, 4  ;;  %p431_p8 = scmp.ne.s32.totalorder %s537_s1, %s430_s27  ;;  %s29_s24 = int_to_ptr.vmem [resolvable:$true] %s28_s24 }
  0x15   :  { %p434_p9 = scmp.lt.u32.totalorder %s430_s27, %s537_s1 }
  0x17   :  { %p436_p10 = pnand %p434_p9, %p431_p8 }
  0x19   :  { %439 = shalt.err (!%p436_p10)
}
  0x1a   :  { %s440_s4 = scalar_lea.vmem %s29_s24, 256  ;;  %p445_p12 = scmp.lt.s32.totalorder %s29_s24, %s29_s24 }
  0x1b   :  { %p441_p11 = scmp.ne.s32.totalorder %s29_s24, %s440_s4  ;;  %p446_p13 = scmp.lt.s32.totalorder %s440_s4, %s440_s4 }
  0x1d   :  { %p447_p0 = por %p446_p13, %p445_p12 }
  0x1f   :  { %p448_p1 = pnand %p447_p0, %p441_p11 }
  0x21   :  { %451 = shalt.err (!%p448_p1)
}
  0x22   :  { %31 = dma.hbm_to_vmem [thread:$0]  %s537_s1, 256, %s29_s24, [#allocation6]  }
  0x23   :  { %474 = dma.done.wait [#allocation3], 8192  }
  0x24   :  { %475 = vsyncadd [#allocation3], 4294959104 }
  0x25   :  { %476 = dma.done.wait [#allocation6], 256  }
  0x26   :  { %477 = vsyncadd [#allocation6], 4294967040  ;;  %v56_v0 = vld [vmem:[#allocation2 + $0x80] sm:$0xff]  ;;  %v57_v1 = vld [vmem:[#allocation2 + $0x88] sm:$0xff]  ;;  %s484_s1 = smov [#allocation7]  }
  0x27   :  { %v88_v2 = vld [vmem:[#allocation2 + $0x180] sm:$0xff]  ;;  %v337_v3 = vpack.c.bf16 %v57_v1, %v56_v0  ;;  %v89_v4 = vld [vmem:[#allocation2 + $0x188] sm:$0xff]  ;;  %v58_v11 = vld [vmem:[#allocation2 + $0x90] sm:$0xff]  ;;  %s257_s6 = sshll.u32 %s484_s1, 4  ;;  %s258_s6 = int_to_ptr.vmem [resolvable:$true] %s257_s6 }
  0x28   :  { %v40_v5 = vld [vmem:[#allocation2] sm:$0xff]  ;;  %v41_v6 = vld [vmem:[#allocation2 + $0x8] sm:$0xff]  ;;  %v369_v7 = vpack.c.bf16 %v89_v4, %v88_v2  ;;  %v59_v13 = vld [vmem:[#allocation2 + $0x98] sm:$0xff]  ;;  %s452_s7 = scalar_lea.vmem %s258_s6, 64  ;;  %p457_p3 = scmp.lt.s32.totalorder %s258_s6, %s258_s6 }
  0x29   :  { %v339_v8 = vpack.c.bf16 %v41_v6, %v40_v5  ;;  %v72_v9 = vld [vmem:[#allocation2 + $0x100] sm:$0xff]  ;;  %v73_v10 = vld [vmem:[#allocation2 + $0x108] sm:$0xff]  ;;  %338 = vmatprep.subr.bf16.mxu0 %v337_v3  ;;  %v90_v14 = vld [vmem:[#allocation2 + $0x190] sm:$0xff]  ;;  %v341_v16 = vpack.c.bf16 %v59_v13, %v58_v11  ;;  %p453_p2 = scmp.ne.s32.totalorder %s258_s6, %s452_s7  ;;  %p458_p4 = scmp.lt.s32.totalorder %s452_s7, %s452_s7 }
  0x2a   :  { %v371_v12 = vpack.c.bf16 %v73_v10, %v72_v9  ;;  %v91_v15 = vld [vmem:[#allocation2 + $0x198] sm:$0xff]  ;;  %370 = vmatprep.subr.bf16.mxu1 %v369_v7  ;;  %v42_v18 = vld [vmem:[#allocation2 + $0x10] sm:$0xff]  ;;  %v60_v23 = vld [vmem:[#allocation2 + $0xa0] sm:$0xff] }
  0x2b   :  { %340 = vmatpush3.bf16.msra.mxu0 %v339_v8  ;;  %v373_v17 = vpack.c.bf16 %v91_v15, %v90_v14  ;;  %v43_v19 = vld [vmem:[#allocation2 + $0x18] sm:$0xff]  ;;  %v74_v20 = vld [vmem:[#allocation2 + $0x110] sm:$0xff]  ;;  %v61_v24 = vld [vmem:[#allocation2 + $0xa8] sm:$0xff]  ;;  %p459_p5 = por %p458_p4, %p457_p3 }
  0x2c   :  { %372 = vmatpush3.bf16.msra.mxu1 %v371_v12  ;;  %v343_v21 = vpack.c.bf16 %v43_v19, %v42_v18  ;;  %v75_v22 = vld [vmem:[#allocation2 + $0x118] sm:$0xff]  ;;  %342 = vmatprep.subr.bf16.mxu0 %v341_v16  ;;  %v345_v26 = vpack.c.bf16 %v61_v24, %v60_v23  ;;  %v92_v27 = vld [vmem:[#allocation2 + $0x1a0] sm:$0xff]  ;;  %v93_v28 = vld [vmem:[#allocation2 + $0x1a8] sm:$0xff] }
  0x2d   :  { %374 = vmatprep.subr.bf16.mxu1 %v373_v17  ;;  %v375_v25 = vpack.c.bf16 %v75_v22, %v74_v20  ;;  %v44_v29 = vld [vmem:[#allocation2 + $0x20] sm:$0xff]  ;;  %v377_v30 = vpack.c.bf16 %v93_v28, %v92_v27  ;;  %v45_v31 = vld [vmem:[#allocation2 + $0x28] sm:$0xff]  ;;  %v62_v35 = vld [vmem:[#allocation2 + $0xb0] sm:$0xff]  ;;  %p460_p6 = pnand %p459_p5, %p453_p2 }
  0x2e   :  { %v76_v32 = vld [vmem:[#allocation2 + $0x120] sm:$0xff]  ;;  %v77_v33 = vld [vmem:[#allocation2 + $0x128] sm:$0xff]  ;;  %v347_v34 = vpack.c.bf16 %v45_v31, %v44_v29  ;;  %v63_v36 = vld [vmem:[#allocation2 + $0xb8] sm:$0xff] }
  0x2f   :  { %344 = vmatpush3.bf16.msra.mxu0 %v343_v21  ;;  %v94_v37 = vld [vmem:[#allocation2 + $0x1b0] sm:$0xff]  ;;  %v379_v38 = vpack.c.bf16 %v77_v33, %v76_v32  ;;  %v349_v39 = vpack.c.bf16 %v63_v36, %v62_v35  ;;  %v95_v40 = vld [vmem:[#allocation2 + $0x1b8] sm:$0xff]  ;;  %v64_v46 = vld [vmem:[#allocation2 + $0xc0] sm:$0xff] }
  0x30   :  { %376 = vmatpush3.bf16.msra.mxu1 %v375_v25  ;;  %346 = vmatprep.subr.bf16.mxu0 %v345_v26  ;;  %v46_v41 = vld [vmem:[#allocation2 + $0x30] sm:$0xff]  ;;  %v47_v42 = vld [vmem:[#allocation2 + $0x38] sm:$0xff]  ;;  %v381_v43 = vpack.c.bf16 %v95_v40, %v94_v37  ;;  %v65_v47 = vld [vmem:[#allocation2 + $0xc8] sm:$0xff] }
  0x31   :  { %378 = vmatprep.subr.bf16.mxu1 %v377_v30  ;;  %v78_v44 = vld [vmem:[#allocation2 + $0x130] sm:$0xff]  ;;  %v79_v45 = vld [vmem:[#allocation2 + $0x138] sm:$0xff]  ;;  %v96_v48 = vld [vmem:[#allocation2 + $0x1c0] sm:$0xff]  ;;  %v351_v50 = vpack.c.bf16 %v47_v42, %v46_v41  ;;  %v353_v52 = vpack.c.bf16 %v65_v47, %v64_v46 }
  0x32   :  { %v97_v49 = vld [vmem:[#allocation2 + $0x1c8] sm:$0xff]  ;;  %v383_v51 = vpack.c.bf16 %v79_v45, %v78_v44  ;;  %v48_v53 = vld [vmem:[#allocation2 + $0x40] sm:$0xff]  ;;  %v66_v58 = vld [vmem:[#allocation2 + $0xd0] sm:$0xff] }
  0x33   :  { %348 = vmatpush3.bf16.msra.mxu0 %v347_v34  ;;  %v49_v54 = vld [vmem:[#allocation2 + $0x48] sm:$0xff]  ;;  %v80_v55 = vld [vmem:[#allocation2 + $0x140] sm:$0xff]  ;;  %v385_v56 = vpack.c.bf16 %v97_v49, %v96_v48  ;;  %v67_v59 = vld [vmem:[#allocation2 + $0xd8] sm:$0xff] }
  0x34   :  { %380 = vmatpush3.bf16.msra.mxu1 %v379_v38  ;;  %350 = vmatprep.subr.bf16.mxu0 %v349_v39  ;;  %v81_v57 = vld [vmem:[#allocation2 + $0x148] sm:$0xff]  ;;  %v98_v60 = vld [vmem:[#allocation2 + $0x1d0] sm:$0xff]  ;;  %v99_v61 = vld [vmem:[#allocation2 + $0x1d8] sm:$0xff]  ;;  %v355_v62 = vpack.c.bf16 %v49_v54, %v48_v53  ;;  %v357_v0 = vpack.c.bf16 %v67_v59, %v66_v58 }
  0x35   :  { %382 = vmatprep.subr.bf16.mxu1 %v381_v43  ;;  %v387_v63 = vpack.c.bf16 %v81_v57, %v80_v55  ;;  %v50_v1 = vld [vmem:[#allocation2 + $0x50] sm:$0xff]  ;;  %v51_v2 = vld [vmem:[#allocation2 + $0x58] sm:$0xff]  ;;  %v389_v4 = vpack.c.bf16 %v99_v61, %v98_v60  ;;  %v68_v6 = vld [vmem:[#allocation2 + $0xe0] sm:$0xff] }
  0x36   :  { %v82_v3 = vld [vmem:[#allocation2 + $0x150] sm:$0xff]  ;;  %v83_v5 = vld [vmem:[#allocation2 + $0x158] sm:$0xff]  ;;  %v69_v7 = vld [vmem:[#allocation2 + $0xe8] sm:$0xff]  ;;  %v359_v10 = vpack.c.bf16 %v51_v2, %v50_v1 }
  0x37   :  { %352 = vmatpush3.bf16.msra.mxu0 %v351_v50  ;;  %v100_v8 = vld [vmem:[#allocation2 + $0x1e0] sm:$0xff]  ;;  %v101_v9 = vld [vmem:[#allocation2 + $0x1e8] sm:$0xff]  ;;  %v391_v13 = vpack.c.bf16 %v83_v5, %v82_v3  ;;  %v361_v14 = vpack.c.bf16 %v69_v7, %v68_v6  ;;  %v70_v20 = vld [vmem:[#allocation2 + $0xf0] sm:$0xff] }
  0x38   :  { %384 = vmatpush3.bf16.msra.mxu1 %v383_v51  ;;  %354 = vmatprep.subr.bf16.mxu0 %v353_v52  ;;  %v52_v11 = vld [vmem:[#allocation2 + $0x60] sm:$0xff]  ;;  %v53_v12 = vld [vmem:[#allocation2 + $0x68] sm:$0xff]  ;;  %v393_v18 = vpack.c.bf16 %v101_v9, %v100_v8  ;;  %v71_v21 = vld [vmem:[#allocation2 + $0xf8] sm:$0xff] }
  0x39   :  { %386 = vmatprep.subr.bf16.mxu1 %v385_v56  ;;  %v84_v15 = vld [vmem:[#allocation2 + $0x160] sm:$0xff]  ;;  %v39_v17 = vld [vmem:[#allocation5 + $0x8] sm:$0xff]  ;;  %v102_v24 = vld [vmem:[#allocation2 + $0x1f0] sm:$0xff]  ;;  %v363_v26 = vpack.c.bf16 %v53_v12, %v52_v11  ;;  %v365_v28 = vpack.c.bf16 %v71_v21, %v70_v20 }
  0x3a   :  { %v38_v16 = vld [vmem:[#allocation5] sm:$0xff]  ;;  %v85_v19 = vld [vmem:[#allocation2 + $0x168] sm:$0xff]  ;;  %v107_v23 = vcombine.high %v39_v17, %v39_v17  ;;  %v103_v25 = vld [vmem:[#allocation2 + $0x1f8] sm:$0xff] }
  0x3b   :  { %356 = vmatpush3.bf16.msra.mxu0 %v355_v62  ;;  %v106_v22 = vcombine.high %v38_v16, %v38_v16  ;;  %v395_v27 = vpack.c.bf16 %v85_v19, %v84_v15  ;;  %v54_v29 = vld [vmem:[#allocation2 + $0x70] sm:$0xff]  ;;  %v55_v30 = vld [vmem:[#allocation2 + $0x78] sm:$0xff]  ;;  %v397_v31 = vpack.c.bf16 %v103_v25, %v102_v24 }
  0x3c   :  { %388 = vmatpush3.bf16.msra.mxu1 %v387_v63  ;;  %358 = vmatprep.subr.bf16.mxu0 %v357_v0  ;;  %v86_v32 = vld [vmem:[#allocation2 + $0x170] sm:$0xff]  ;;  %v87_v33 = vld [vmem:[#allocation2 + $0x178] sm:$0xff]  ;;  %v367_v34 = vpack.c.bf16 %v55_v30, %v54_v29 }
  0x3d   :  { %390 = vmatprep.subr.bf16.mxu1 %v389_v4  ;;  %174 = vmatprep.mubr.f32.mxu0 %v106_v22  ;;  %v399_v35 = vpack.c.bf16 %v87_v33, %v86_v32 }
  0x3e   :  { %244 = vmatprep.mubr.f32.mxu1 %v107_v23 }
  0x3f   :  { %360 = vmatpush3.bf16.msra.mxu0 %v359_v10 }
  0x40   :  { %392 = vmatpush3.bf16.msra.mxu1 %v391_v13  ;;  %362 = vmatprep.subr.bf16.mxu0 %v361_v14 }
  0x41   :  { %394 = vmatprep.subr.bf16.mxu1 %v393_v18 }
  0x43   :  { %364 = vmatpush3.bf16.msra.mxu0 %v363_v26 }
  0x44   :  { %396 = vmatpush3.bf16.msra.mxu1 %v395_v27  ;;  %366 = vmatprep.subr.bf16.mxu0 %v365_v28 }
  0x45   :  { %398 = vmatprep.subr.bf16.mxu1 %v397_v31 }
  0x47   :  { %368 = vmatpush3.bf16.msra.mxu0 %v367_v34 }
  0x48   :  { %400 = vmatpush3.bf16.msra.mxu1 %v399_v35 }
  0x4a   :  { %175 = vmatmul.mubr.f32.vlgmr.msra.gmra.mrb[0].mxu0 %v38_v16 }
  0x4b   :  { %245 = vmatmul.mubr.f32.vlgmr.msra.gmra.mrb[0].mxu1 %v39_v17 }
 0x11d   :  { %v299_v36 = vpop.f32.mrb[0].mxu0 }
 0x11e   :  { %v334_v37 = vpop.f32.mrb[0].mxu1  ;;  %v300_v38 = vpop.f32.mrb[1].mxu0 }
 0x11f   :  { %v301_v39 = vadd.f32 %v300_v38, %v299_v36  ;;  %v335_v40 = vpop.f32.mrb[1].mxu1 }
 0x120   :  { %v336_v41 = vadd.f32 %v335_v40, %v334_v37 }
 0x122   :  { %v247_v42 = vadd.f32 %v336_v41, %v301_v39 }
 0x124   :  { %250 = vst [vmem:[#allocation7] sm:$0xf] %v247_v42 }
 0x125   :  { %463 = shalt.err (!%p460_p6)
}
 0x126   :  { %s464_s10 = scalar_lea.hbm %s538_s2, 64 }
 0x127   :  { %p465_p7 = scmp.ne.s32.totalorder %s538_s2, %s464_s10  ;;  %p468_p8 = scmp.lt.u32.totalorder %s464_s10, %s538_s2 }
 0x129   :  { %p470_p9 = pnand %p468_p8, %p465_p7 }
 0x12b   :  { %473 = shalt.err (!%p470_p9)
}
 0x12c   :  { %260 = dma.vmem_to_hbm [thread:$0]  %s258_s6, 64, %s538_s2, [#allocation4]  }
 0x12d   :  { %478 = dma.done.wait [#allocation4], 64  }
 0x12e   :  { %479 = vsyncadd [#allocation4], 4294967232 }
 0x12f   :  { %264 = vsyncpa [#allocation3], 1 }
 0x130   :  { %265 = vsyncpa [#allocation6], 1 }
 0x131   :  { %266 = vsyncpa [#allocation4], 1 }

</bundles_post_ra>
